<compile_context>
chip_gen: v5e
topology: v5e:2x2
jax: 0.10.0
libtpu: 0.0.40
codegen_flags: <defaults>
</compile_context>

<pallas_src>
import math
from functools import partial

import jax
import jax.numpy as jnp
from jax.experimental import pallas as pl
from jax.experimental.pallas import tpu as pltpu

_LANES = 128


def _discriminator_kernel(x_ref, w0_ref, b0_ref, w1_ref, b1_ref, w2_ref, o_ref, *, slope):
    """Fused 3-layer equalized-LR MLP on one batch tile (rows pre-packed 4-per-vector-row).

    x_ref  : (TB, pack*d_in_pad)   bf16
    w0/w1  : block-diagonal, bf16, eq-LR scale pre-folded
    b0/b1  : (1, pack*latent)      f32 (tiled per group)
    w2_ref : (pack*latent, pack)   bf16 block-diagonal
    o_ref  : (TB, pack)            f32 (one scalar per original batch row)
    """
    x = x_ref[...]

    # layer 0 : bf16 MXU matmul, f32 accumulation, f32 epilogue
    h = jnp.dot(x, w0_ref[...], preferred_element_type=jnp.float32) + b0_ref[...]
    h = jnp.maximum(h, slope * h)                       # leaky_relu(0.2): 2 VALU ops

    # layer 1
    h = jnp.dot(h.astype(w1_ref.dtype), w1_ref[...],
                preferred_element_type=jnp.float32) + b1_ref[...]
    h = jnp.maximum(h, slope * h)

    # layer 2 (out_features == 1 per group): fused into the same bf16 MXU path via the
    # (pack*latent, pack) block-diagonal w2.  Scalar bias b2 is added in the wrapper.
    o = jnp.dot(h.astype(w2_ref.dtype), w2_ref[...],
                preferred_element_type=jnp.float32)
    o_ref[...] = o.astype(o_ref.dtype)


def init_discriminator_params(key, latent_size, n_layers=3, progan_variation=False):
    """Synthetic init matching LinearNormalizedLR shapes.

    weight ~ N(0, 1) (equalized-LR convention; scale sqrt(2/in) applied at runtime),
    bias small deterministic values (zero in the original; nonzero here to exercise
    the add path).
    """
    params = []
    for i in range(n_layers):
        out_size = latent_size if i != n_layers - 1 else 1
        in_size = latent_size if not (i == 0 and progan_variation) else latent_size + 1
        key, wk = jax.random.split(key)
        w = jax.random.normal(wk, (in_size, out_size), dtype=jnp.float32)
        b = 0.01 * jnp.arange(out_size, dtype=jnp.float32).reshape(1, out_size)
        scale = math.sqrt(2.0 / in_size)                # equalized learning-rate multiplier
        params.append((w, b, scale))
    return params


def _next_pow2(n):
    p = 1
    while p < n:
        p *= 2
    return p


def _round_up(n, m):
    return ((n + m - 1) // m) * m


def _prepare_packed_params(params, pack, d_in_pad):
    """Fold eq-LR scales, pad w0's input rows, build block-diagonal bf16 weights.

    Done once in the wrapper; the kernel sees resident, lane-dense weight tiles.
    """
    (w0, b0, s0), (w1, b1, s1), (w2, b2, s2) = params
    eye = jnp.eye(pack, dtype=jnp.float32)

    w0s = w0 * s0
    w0s = jnp.pad(w0s, ((0, d_in_pad - w0s.shape[0]), (0, 0)))   # zero rows for padded feats
    w0p = jnp.kron(eye, w0s).astype(jnp.bfloat16)                # (pack*d_in_pad, pack*latent)
    w1p = jnp.kron(eye, w1 * s1).astype(jnp.bfloat16)            # (pack*latent, pack*latent)
    w2p = jnp.kron(eye, w2 * s2).astype(jnp.bfloat16)            # (pack*latent, pack)

    b0p = jnp.tile(b0, (1, pack)).astype(jnp.float32)            # (1, pack*latent)
    b1p = jnp.tile(b1, (1, pack)).astype(jnp.float32)
    b2s = jnp.asarray(b2, jnp.float32).reshape(())               # scalar, added in wrapper
    return w0p, b0p, w1p, b1p, w2p, b2s


def discriminator_forward(x, params, latent_size, progan_variation=False, block_rows=2048):
    # glue: flatten to (-1, latent_size), exactly like x.view(-1, latent_size)
    x = x.reshape(-1, latent_size).astype(jnp.float32)

    if progan_variation:
        # glue: minibatch-stddev feature (tiny batch-wide reduction)
        stddevs = jnp.std(x, axis=0, keepdims=True, ddof=1)      # torch.std is unbiased
        stddev = jnp.mean(stddevs)
        feature = jnp.zeros_like(x[:, :1]) + stddev
        x = jnp.concatenate([x, feature], axis=1)

    B, d_in = x.shape
    d_in_pad = _next_pow2(max(d_in, 1))                 # 32 -> 32; 33 (progan) -> 64
    pack = max(1, _LANES // d_in_pad)                   # 4 rows/vector-row for latent=32

    w0, b0, w1, b1, w2, b2 = _prepare_packed_params(params, pack, d_in_pad)

    # pad features to d_in_pad (the matching weight rows are zero) and batch to a
    # multiple of `pack`, then pack `pack` rows per vector row (free row-major view).
    b_rows = _round_up(B, pack)
    x = jnp.pad(x, ((0, b_rows - B), (0, d_in_pad - d_in)))
    xp = x.reshape(b_rows // pack, pack * d_in_pad).astype(jnp.bfloat16)
    bp = xp.shape[0]                                    # packed rows

    # batch tiling: large tiles amortize the ~0.35us/step grid overhead; balance tiles
    # across the grid so padding stays small even when bp is just over block_rows.
    ntiles = max(1, -(-bp // block_rows))
    tb = _round_up(-(-bp // ntiles), 8)                 # multiple of 8 sublanes
    bp_pad = _round_up(bp, tb)
    if bp_pad != bp:
        xp = jnp.pad(xp, ((0, bp_pad - bp), (0, 0)))

    kernel = partial(_discriminator_kernel, slope=0.2)

    # weights/biases: full-array block, constant index_map -> VMEM-resident across tiles
    resident = lambda a: pl.BlockSpec(a.shape, lambda i: (0,) * a.ndim)

    out = pl.pallas_call(
        kernel,
        out_shape=jax.ShapeDtypeStruct((bp_pad, pack), jnp.float32),
        grid=(bp_pad // tb,),
        in_specs=[
            pl.BlockSpec((tb, pack * d_in_pad), lambda i: (i, 0)),   # x: tiled over batch
            resident(w0), resident(b0),
            resident(w1), resident(b1),
            resident(w2),
        ],
        out_specs=pl.BlockSpec((tb, pack), lambda i: (i, 0)),
        compiler_params=pltpu.CompilerParams(
            dimension_semantics=("parallel",)),          # shard batch tiles across TCs
    )(xp, w0, b0, w1, b1, w2)

    # un-pack: row-major flatten restores original row order; slice padding; add scalar b2.
    out = out.reshape(-1, 1)[:B] + b2
    return out


def discriminator_reference_f32(x, params, latent_size, progan_variation=False):
    """Pure-f32 JAX reference mirroring the PyTorch forward."""
    x = x.reshape(-1, latent_size).astype(jnp.float32)
    if progan_variation:
        stddevs = jnp.std(x, axis=0, keepdims=True, ddof=1)
        stddev = jnp.mean(stddevs)
        feature = jnp.zeros_like(x[:, :1]) + stddev
        x = jnp.concatenate([x, feature], axis=1)
    n = len(params)
    for i, (w, b, s) in enumerate(params):
        x = x @ w * s + b
        if i != n - 1:
            x = jnp.where(x > 0, x, 0.2 * x)
    return x


def discriminator_reference_mixed(x, params, latent_size, progan_variation=False):
    """Reference mirroring the kernel's bf16-input / f32-accumulate numerics (unpacked)."""
    x = x.reshape(-1, latent_size).astype(jnp.float32)
    if progan_variation:
        stddevs = jnp.std(x, axis=0, keepdims=True, ddof=1)
        stddev = jnp.mean(stddevs)
        feature = jnp.zeros_like(x[:, :1]) + stddev
        x = jnp.concatenate([x, feature], axis=1)
    (w0, b0, s0), (w1, b1, s1), (w2, b2, s2) = params
    h = jnp.dot(x.astype(jnp.bfloat16), (w0 * s0).astype(jnp.bfloat16),
                preferred_element_type=jnp.float32) + b0
    h = jnp.maximum(h, 0.2 * h)
    h = jnp.dot(h.astype(jnp.bfloat16), (w1 * s1).astype(jnp.bfloat16),
                preferred_element_type=jnp.float32) + b1
    h = jnp.maximum(h, 0.2 * h)
    return jnp.dot(h.astype(jnp.bfloat16), (w2 * s2).astype(jnp.bfloat16),
                   preferred_element_type=jnp.float32) + b2


if __name__ == "__main__":
    latent_size = 32
    n_layers = 3
    progan_variation = False   # module default

    key = jax.random.PRNGKey(0)
    key, xk = jax.random.split(key)

    # input of shape (2, 4, 32); forward views it as (-1, latent_size) = (8, 32)
    x = jax.random.normal(xk, (2, 4, latent_size), dtype=jnp.float32)

    params = init_discriminator_params(key, latent_size, n_layers, progan_variation)

    out = discriminator_forward(x, params, latent_size, progan_variation)
    out = jax.block_until_ready(out)
    assert out.shape == (8, 1), out.shape

    # check against a reference with the same bf16-in / f32-accumulate numerics
    # (tolerance allows for MXU accumulation-order / bf16 rounding-boundary differences)
    ref_mixed = discriminator_reference_mixed(x, params, latent_size, progan_variation)
    assert jnp.allclose(out, ref_mixed, atol=1e-2, rtol=1e-2), (out, ref_mixed)

    # semantic sanity check against the pure-f32 PyTorch-equivalent reference
    # (loose tolerance accounts for the bf16 MXU inputs)
    ref_f32 = discriminator_reference_f32(x, params, latent_size, progan_variation)
    assert jnp.allclose(out, ref_f32, atol=0.2, rtol=0.2), (out, ref_f32)

    print("KERNEL_OK")
</pallas_src>

<mosaic_0001>
module attributes {stable_mosaic.version = 11 : i64} {
  func.func @_discriminator_kernel(%arg0: i32, %arg1: memref<8x128xbf16, #tpu.memory_space<vmem>>, %arg2: memref<128x128xbf16, #tpu.memory_space<vmem>>, %arg3: memref<1x128xf32, #tpu.memory_space<vmem>>, %arg4: memref<128x128xbf16, #tpu.memory_space<vmem>>, %arg5: memref<1x128xf32, #tpu.memory_space<vmem>>, %arg6: memref<128x4xbf16, #tpu.memory_space<vmem>>, %arg7: memref<8x4xf32, #tpu.memory_space<vmem>>) attributes {dimension_semantics = [#tpu.dimension_semantics<parallel>], iteration_bounds = array<i64: 1>, scalar_prefetch = 0 : i64, scratch_operands = 0 : i64, tpu.core_type = #tpu.core_type<tc>, window_params = [{transform_indices = @transform_0, window_bounds = array<i64: 8, 128>}, {pipeline_mode = #tpu.pipeline_mode<synchronous>, transform_indices = @transform_1, window_bounds = array<i64: 128, 128>}, {pipeline_mode = #tpu.pipeline_mode<synchronous>, transform_indices = @transform_2, window_bounds = array<i64: 1, 128>}, {pipeline_mode = #tpu.pipeline_mode<synchronous>, transform_indices = @transform_3, window_bounds = array<i64: 128, 128>}, {pipeline_mode = #tpu.pipeline_mode<synchronous>, transform_indices = @transform_4, window_bounds = array<i64: 1, 128>}, {pipeline_mode = #tpu.pipeline_mode<synchronous>, transform_indices = @transform_5, window_bounds = array<i64: 128, 4>}, {transform_indices = @transform_6, window_bounds = array<i64: 8, 4>}]} {
    %c0 = arith.constant 0 : index
    %c0_0 = arith.constant 0 : index
    %0 = vector.load %arg1[%c0, %c0_0] : memref<8x128xbf16, #tpu.memory_space<vmem>>, vector<8x128xbf16>
    %c0_1 = arith.constant 0 : index
    %c0_2 = arith.constant 0 : index
    %1 = vector.load %arg2[%c0_1, %c0_2] : memref<128x128xbf16, #tpu.memory_space<vmem>>, vector<128x128xbf16>
    %cst = arith.constant dense<0.000000e+00> : vector<8x128xf32>
    %2 = tpu.matmul %0, %1, %cst {dimension_numbers = #tpu.dot_dimension_numbers<[1], [0], [0], [1], [0, 0, 1, 1], [], []>} : vector<8x128xbf16>, vector<128x128xbf16>, vector<8x128xf32> -> vector<8x128xf32>
    %c0_3 = arith.constant 0 : index
    %c0_4 = arith.constant 0 : index
    %3 = vector.load %arg3[%c0_3, %c0_4] : memref<1x128xf32, #tpu.memory_space<vmem>>, vector<1x128xf32>
    %4 = vector.broadcast %3 : vector<1x128xf32> to vector<8x128xf32>
    %5 = arith.addf %2, %4 : vector<8x128xf32>
    %cst_5 = arith.constant 2.000000e-01 : f32
    %6 = vector.broadcast %cst_5 : f32 to vector<8x128xf32>
    %7 = arith.mulf %6, %5 : vector<8x128xf32>
    %8 = arith.maximumf %5, %7 : vector<8x128xf32>
    %9 = arith.truncf %8 : vector<8x128xf32> to vector<8x128xbf16>
    %c0_6 = arith.constant 0 : index
    %c0_7 = arith.constant 0 : index
    %10 = vector.load %arg4[%c0_6, %c0_7] : memref<128x128xbf16, #tpu.memory_space<vmem>>, vector<128x128xbf16>
    %cst_8 = arith.constant dense<0.000000e+00> : vector<8x128xf32>
    %11 = tpu.matmul %9, %10, %cst_8 {dimension_numbers = #tpu.dot_dimension_numbers<[1], [0], [0], [1], [0, 0, 1, 1], [], []>} : vector<8x128xbf16>, vector<128x128xbf16>, vector<8x128xf32> -> vector<8x128xf32>
    %c0_9 = arith.constant 0 : index
    %c0_10 = arith.constant 0 : index
    %12 = vector.load %arg5[%c0_9, %c0_10] : memref<1x128xf32, #tpu.memory_space<vmem>>, vector<1x128xf32>
    %13 = vector.broadcast %12 : vector<1x128xf32> to vector<8x128xf32>
    %14 = arith.addf %11, %13 : vector<8x128xf32>
    %cst_11 = arith.constant 2.000000e-01 : f32
    %15 = vector.broadcast %cst_11 : f32 to vector<8x128xf32>
    %16 = arith.mulf %15, %14 : vector<8x128xf32>
    %17 = arith.maximumf %14, %16 : vector<8x128xf32>
    %18 = arith.truncf %17 : vector<8x128xf32> to vector<8x128xbf16>
    %c0_12 = arith.constant 0 : index
    %c0_13 = arith.constant 0 : index
    %19 = vector.load %arg6[%c0_12, %c0_13] : memref<128x4xbf16, #tpu.memory_space<vmem>>, vector<128x4xbf16>
    %cst_14 = arith.constant dense<0.000000e+00> : vector<8x4xf32>
    %20 = tpu.matmul %18, %19, %cst_14 {dimension_numbers = #tpu.dot_dimension_numbers<[1], [0], [0], [1], [0, 0, 1, 1], [], []>} : vector<8x128xbf16>, vector<128x4xbf16>, vector<8x4xf32> -> vector<8x4xf32>
    %c0_15 = arith.constant 0 : index
    %c0_16 = arith.constant 0 : index
    %21 = vector.load %arg7[%c0_15, %c0_16] : memref<8x4xf32, #tpu.memory_space<vmem>>, vector<8x4xf32>
    tpu.vector_store %arg7[%c0_15, %c0_16], %20 {strides = array<i32>} : memref<8x4xf32, #tpu.memory_space<vmem>>, vector<8x4xf32>,
    return
  }
  func.func @transform_0(%arg0: i32) -> (i32, i32) {
    %c0_i32 = arith.constant 0 : i32
    %c0_i32_0 = arith.constant 0 : i32
    return %arg0, %c0_i32 : i32, i32
  }
  func.func @transform_1(%arg0: i32) -> (i32, i32) {
    %c0_i32 = arith.constant 0 : i32
    %c0_i32_0 = arith.constant 0 : i32
    %c0_i32_1 = arith.constant 0 : i32
    return %c0_i32, %c0_i32_0 : i32, i32
  }
  func.func @transform_2(%arg0: i32) -> (i32, i32) {
    %c0_i32 = arith.constant 0 : i32
    %c0_i32_0 = arith.constant 0 : i32
    %c0_i32_1 = arith.constant 0 : i32
    return %c0_i32, %c0_i32_0 : i32, i32
  }
  func.func @transform_3(%arg0: i32) -> (i32, i32) {
    %c0_i32 = arith.constant 0 : i32
    %c0_i32_0 = arith.constant 0 : i32
    %c0_i32_1 = arith.constant 0 : i32
    return %c0_i32, %c0_i32_0 : i32, i32
  }
  func.func @transform_4(%arg0: i32) -> (i32, i32) {
    %c0_i32 = arith.constant 0 : i32
    %c0_i32_0 = arith.constant 0 : i32
    %c0_i32_1 = arith.constant 0 : i32
    return %c0_i32, %c0_i32_0 : i32, i32
  }
  func.func @transform_5(%arg0: i32) -> (i32, i32) {
    %c0_i32 = arith.constant 0 : i32
    %c0_i32_0 = arith.constant 0 : i32
    %c0_i32_1 = arith.constant 0 : i32
    return %c0_i32, %c0_i32_0 : i32, i32
  }
  func.func @transform_6(%arg0: i32) -> (i32, i32) {
    %c0_i32 = arith.constant 0 : i32
    %c0_i32_0 = arith.constant 0 : i32
    return %arg0, %c0_i32 : i32, i32
  }
}

</mosaic_0001>

<bundles_post_ra>
// kernel: tpu_custom_call.1
= control target key start
LH: loop header
LB: loop body
LE: loop exit
PB: predicated region body
PF: predicated region fallthrough
CT: control target
= control target key end

     0   :  { %11 = vsyncpa [#allocation3], 0  ;;  %s587_s0 = inlined_call_operand.hbm [shape: bf16[8,128], index: 0, kind: input, shape index: {}]   ;;  %s588_s1 = inlined_call_operand.vmem [shape: bf16[128,128], index: 1, kind: input, shape index: {}]   ;;  %s589_s2 = inlined_call_operand.vmem [shape: f32[1,128], index: 2, kind: input, shape index: {}]   ;;  %s590_s3 = inlined_call_operand.hbm [shape: bf16[128,128], index: 3, kind: input, shape index: {}]   ;;  %s591_s4 = inlined_call_operand.vmem [shape: f32[1,128], index: 4, kind: input, shape index: {}]   ;;  %s592_s5 = inlined_call_operand.vmem [shape: bf16[128,4], index: 5, kind: input, shape index: {}]   ;;  %s593_s6 = inlined_call_operand.vmem [shape: f32[8,4], index: 6, kind: output, shape index: {}]  }
   0x1   :  { %s18_s23 = sshll.u32 %s587_s0, 4  ;;  %s19_s23 = int_to_ptr.hbm [resolvable:$true] %s18_s23 }
   0x2   :  { %12 = vsyncpa [#allocation5], 0  ;;  %s485_s24 = smov [#allocation2]   ;;  %s32_s28 = sshll.u32 %s590_s3, 4  ;;  %s33_s28 = int_to_ptr.hbm [resolvable:$true] %s32_s28 }
   0x3   :  { %s20_s25 = sshll.u32 %s485_s24, 4  ;;  %s486_s29 = smov [#allocation4]   ;;  %s21_s25 = int_to_ptr.vmem [resolvable:$true] %s20_s25 }
   0x4   :  { %23 = dma.hbm_to_vmem [thread:$0]  %s19_s23, 64, %s21_s25, [#allocation3]  }
   0x5   :  { %s34_s30 = sshll.u32 %s486_s29, 4  ;;  %s487_s7 = smov 64   ;;  %s35_s30 = int_to_ptr.vmem [resolvable:$true] %s34_s30 }
   0x6   :  { %s488_s8 = smov 4  }
   0x7   :  { %40 = dma.hbm_to_vmem [thread:$0]  %s33_s28, 1024, %s35_s30, [#allocation5], %s487_s7, %s487_s7, %s488_s8  }
   0x8   :  { %481 = dma.done.wait [#allocation3], 64  }
   0x9   :  { %482 = vsyncadd [#allocation3], 4294967232 }
   0xa   :  { %483 = dma.done.wait [#allocation5], 1024  }
   0xb   :  { %484 = vsyncadd [#allocation5], 4294966272  ;;  %v410_v0 = vld [vmem:[%s588_s1 + $0x38] sm:$0xff]  ;;  %v409_v1 = vld [vmem:[%s588_s1 + $0x30] sm:$0xff]  ;;  %vm299_vm0 = vcmask 31744  }
   0xc   :  { %122 = vmatpush.bf16.msra.mxu0 %v410_v0  ;;  %v418_v2 = vld [vmem:[#allocation4 + $0x38] sm:$0xff]  ;;  %v417_v3 = vld [vmem:[#allocation4 + $0x30] sm:$0xff]  ;;  %v408_v4 = vld [vmem:[%s588_s1 + $0x28] sm:$0xff] }
   0xd   :  { %206 = vmatpush.bf16.msra.mxu1 %v418_v2  ;;  %v416_v5 = vld [vmem:[#allocation4 + $0x28] sm:$0xff]  ;;  %v407_v6 = vld [vmem:[%s588_s1 + $0x20] sm:$0xff]  ;;  %v406_v8 = vld [vmem:[%s588_s1 + $0x18] sm:$0xff] }
   0xe   :  { %v415_v7 = vld [vmem:[#allocation4 + $0x20] sm:$0xff]  ;;  %v414_v9 = vld [vmem:[#allocation4 + $0x18] sm:$0xff]  ;;  %v405_v10 = vld [vmem:[%s588_s1 + $0x10] sm:$0xff] }
   0xf   :  { %v413_v11 = vld [vmem:[#allocation4 + $0x10] sm:$0xff]  ;;  %v404_v12 = vld [vmem:[%s588_s1 + $0x8] sm:$0xff]  ;;  %v403_v13 = vld [vmem:[%s588_s1] sm:$0xff] }
  0x10   :  { %123 = vmatpush.bf16.msra.mxu0 %v409_v1  ;;  %v53_v14 = vld [vmem:[#allocation2] sm:$0xf]  ;;  %v412_v15 = vld [vmem:[#allocation4 + $0x8] sm:$0xff]  ;;  %v411_v16 = vld [vmem:[#allocation4] sm:$0xff] }
  0x11   :  { %207 = vmatpush.bf16.msra.mxu1 %v417_v3  ;;  %v426_v17 = vld [vmem:[%s592_s5 + $0x38] sm:$0xff]  ;;  %v425_v18 = vld [vmem:[%s592_s5 + $0x30] sm:$0xff]  ;;  %v424_v19 = vld [vmem:[%s592_s5 + $0x28] sm:$0xff] }
  0x12   :  { %286 = vmatpush.bf16.msra.mxu2 %v426_v17  ;;  %v423_v20 = vld [vmem:[%s592_s5 + $0x20] sm:$0xff]  ;;  %v422_v21 = vld [vmem:[%s592_s5 + $0x18] sm:$0xff]  ;;  %v421_v22 = vld [vmem:[%s592_s5 + $0x10] sm:$0xff] }
  0x13   :  { %v431_v23 = vld [vmem:[%s589_s2] ss:$0 sm:$0xff]  ;;  %v420_v30 = vld [vmem:[%s592_s5 + $0x8] sm:$0xff] }
  0x14   :  { %124 = vmatpush.bf16.msra.mxu0 %v408_v4  ;;  %v419_v31 = vld [vmem:[%s592_s5] sm:$0xff] }
  0x15   :  { %208 = vmatpush.bf16.msra.mxu1 %v416_v5  ;;  %v432_v32 = vld [vmem:[%s591_s4] ss:$0 sm:$0xff] }
  0x16   :  { %287 = vmatpush.bf16.msra.mxu2 %v425_v18 }
  0x18   :  { %125 = vmatpush.bf16.msra.mxu0 %v407_v6 }
  0x19   :  { %209 = vmatpush.bf16.msra.mxu1 %v415_v7 }
  0x1a   :  { %288 = vmatpush.bf16.msra.mxu2 %v424_v19 }
  0x1c   :  { %126 = vmatpush.bf16.msra.mxu0 %v406_v8 }
  0x1d   :  { %210 = vmatpush.bf16.msra.mxu1 %v414_v9 }
  0x1e   :  { %289 = vmatpush.bf16.msra.mxu2 %v423_v20 }
  0x20   :  { %127 = vmatpush.bf16.msra.mxu0 %v405_v10 }
  0x21   :  { %211 = vmatpush.bf16.msra.mxu1 %v413_v11 }
  0x22   :  { %290 = vmatpush.bf16.msra.mxu2 %v422_v21 }
  0x24   :  { %128 = vmatpush.bf16.msra.mxu0 %v404_v12 }
  0x25   :  { %212 = vmatpush.bf16.msra.mxu1 %v412_v15 }
  0x26   :  { %291 = vmatpush.bf16.msra.mxu2 %v421_v22 }
  0x28   :  { %129 = vmatpush.bf16.msra.mxu0 %v403_v13 }
  0x29   :  { %213 = vmatpush.bf16.msra.mxu1 %v411_v16 }
  0x2a   :  { %292 = vmatpush.bf16.msra.mxu2 %v420_v30 }
  0x2b   :  { %130 = vmatmul.bf16.vlgmr.msra.gmra.mxu0 %v53_v14 }
  0x2e   :  { %293 = vmatpush.bf16.msra.mxu2 %v419_v31 }
  0xa8   :  { %v131_v24 = vpop.f32.mrf.mxu0 }
  0xa9   :  { %v132_v25 = vadd.f32 %v431_v23, %v131_v24 }
  0xab   :  { %v135_v26 = vmul.f32 0.2, %v132_v25 }
  0xad   :  { %v136_v27 = vmax.f32 %v132_v25, %v135_v26 }
  0xaf   :  { %v137_v28 = vpack.c.bf16 %v136_v27, %v136_v27 }
  0xb0   :  { %v133_v29 = vpop.f32.mrf.mxu0 }
  0xb1   :  { %214 = vmatmul.bf16.vlgmr.msra.gmra.mxu1 %v137_v28 }
 0x12e   :  { %v215_v33 = vpop.f32.mrf.mxu1 }
 0x12f   :  { %v216_v34 = vadd.f32 %v432_v32, %v215_v33 }
 0x131   :  { %v219_v35 = vmul.f32 0.2, %v216_v34 }
 0x133   :  { %v220_v36 = vmax.f32 %v216_v34, %v219_v35 }
 0x135   :  { %v221_v37 = vpack.c.bf16 %v220_v36, %v220_v36 }
 0x136   :  { %v217_v38 = vpop.f32.mrf.mxu1 }
 0x137   :  { %294 = vmatmul.bf16.vlgmr.msra.gmra.mxu2 %v221_v37 }
 0x1ba   :  { %v295_v39 = vpop.f32.mrf.mxu2 }
 0x1bb   :  { %300 = vst.msk [vmem:[%s593_s6] sm:$0xff] %vm299_vm0, %v295_v39 }
 0x1c2   :  { %v297_v40 = vpop.f32.mrf.mxu2 }
 0x1c3   :  { %305 = vsyncpa [#allocation3], 1 }
 0x1c4   :  { %306 = vsyncpa [#allocation5], 1 }

</bundles_post_ra>
